<compile_context>
chip_gen: v5e
topology: v5e:2x2
jax: 0.10.0
libtpu: 0.0.40
codegen_flags: <defaults>
</compile_context>

<pallas_src>
import functools

import jax
import jax.numpy as jnp
from jax import lax
from jax.experimental import pallas as pl
from jax.experimental.pallas import tpu as pltpu


# ----------------------------------------------------------------------------
# small helpers
# ----------------------------------------------------------------------------
def _round_up(n, m):
    return ((n + m - 1) // m) * m


def _pad_to(a, shape):
    pads = tuple((0, s - d) for d, s in zip(a.shape, shape))
    return jnp.pad(a, pads)


# ----------------------------------------------------------------------------
# Pallas kernel: fused SceneNet MLP head, channel-first, one (batch, point-tile)
# grid step per invocation.  Everything batch-dependent except the per-point
# features has been folded into b0_eff outside the kernel.
# ----------------------------------------------------------------------------
def _scene_net_head_kernel(num_extra, *refs):
    """refs (inputs, in order):
       feat_ref   (1, F_pad, TP)   per-point features [pt_loc | conv_pts], channel-first
       b0_ref     (1, H0_pad, 1)   per-batch effective first-layer bias
       w0_ref     (H0_pad, F_pad)  folded first-layer weight
       then for each remaining hidden layer: w (Hout_pad, Hin_pad), b (Hout_pad, 1)
       then w_out (C_pad, Hlast_pad), b_out (C_pad, 1);
       output: out_ref (1, C_pad, TP).
    """
    feat_ref, b0_ref, w0_ref = refs[:3]
    rest = refs[3:]
    hidden_refs = rest[:2 * num_extra]
    w_out_ref, b_out_ref, out_ref = rest[2 * num_extra:]

    x = feat_ref[0]                                                 # (F_pad, TP)

    # first Conv1d(k=1) + (folded) BatchNorm + ReLU
    h = jnp.dot(w0_ref[...], x, preferred_element_type=jnp.float32) + b0_ref[0]
    h = jnp.maximum(h, 0.0)                                         # (H0_pad, TP)

    # remaining hidden Conv1d(k=1) + BN + ReLU layers (BN folded into w/b)
    for i in range(num_extra):
        w_r = hidden_refs[2 * i]
        b_r = hidden_refs[2 * i + 1]
        h = jnp.dot(w_r[...], h, preferred_element_type=jnp.float32) + b_r[...]
        h = jnp.maximum(h, 0.0)

    # out_conv
    out_ref[0] = (jnp.dot(w_out_ref[...], h, preferred_element_type=jnp.float32)
                  + b_out_ref[...])                                  # (C_pad, TP)


def scene_net_head(feat, b0_eff, w0, hidden_layers, w_out, b_out,
                   num_classes, num_points, point_tile=2048):
    """feat: (B, F_pad, P) f32 channel-first per-point features.
    b0_eff: (B, H0_pad, 1) per-batch first-layer bias (global-max / BN folded).
    w0: (H0_pad, F_pad); hidden_layers: [(w, b), ...]; w_out: (C_pad, Hlast_pad);
    b_out: (C_pad, 1).  Returns (B, num_classes, num_points) f32.
    """
    B, F_pad, P = feat.shape
    H0_pad = w0.shape[0]
    C_pad = w_out.shape[0]

    # Point tiling: lane-dense tiles, conservative default fits v7x's 64 MiB VMEM;
    # bump point_tile (e.g. 8192) on v6e for better pipelining efficiency.
    tp = min(point_tile, _round_up(P, 128))
    P_pad = _round_up(P, tp)
    if P_pad != P:
        feat = jnp.pad(feat, ((0, 0), (0, 0), (0, P_pad - P)))

    inputs = [feat, b0_eff, w0]
    in_specs = [
        pl.BlockSpec((1, F_pad, tp), lambda b, p: (b, 0, p)),
        pl.BlockSpec((1, H0_pad, 1), lambda b, p: (b, 0, 0)),
        pl.BlockSpec(w0.shape, lambda b, p: (0, 0)),
    ]
    for w, bvec in hidden_layers:
        inputs += [w, bvec]
        in_specs += [pl.BlockSpec(w.shape, lambda b, p: (0, 0)),
                     pl.BlockSpec(bvec.shape, lambda b, p: (0, 0))]
    inputs += [w_out, b_out]
    in_specs += [pl.BlockSpec(w_out.shape, lambda b, p: (0, 0)),
                 pl.BlockSpec(b_out.shape, lambda b, p: (0, 0))]

    # Explicit VMEM budget sized from the point tile (double-buffered in/out blocks
    # plus the widest activation), clamped well under v7x's 64 MiB physical VMEM.
    widest = max([H0_pad, C_pad] + [w.shape[0] for w, _ in hidden_layers])
    per_step = 4 * tp * (2 * F_pad + 2 * C_pad + 2 * widest)
    vmem_limit = int(min(48 * 1024 * 1024, max(8 * 1024 * 1024, 4 * per_step)))

    kernel = functools.partial(_scene_net_head_kernel, len(hidden_layers))
    out = pl.pallas_call(
        kernel,
        out_shape=jax.ShapeDtypeStruct((B, C_pad, P_pad), jnp.float32),
        grid=(B, P_pad // tp),
        in_specs=in_specs,
        out_specs=pl.BlockSpec((1, C_pad, tp), lambda b, p: (b, 0, p)),
        compiler_params=pltpu.CompilerParams(
            dimension_semantics=("parallel", "parallel"),
            vmem_limit_bytes=vmem_limit),
    )(*inputs)
    return out[:, :num_classes, :num_points]


# ----------------------------------------------------------------------------
# JAX glue: GENEO 3-D convolution over the voxel grid + voxel -> point gather.
# ----------------------------------------------------------------------------
def geneo_conv3d(vox, kernels):
    # vox: (B, Z, X, Y) f32;  kernels: (Gt, kz, kx, ky) f32  ->  (B, Gt, Z, X, Y)
    x = vox[:, None]                 # (B, 1, Z, X, Y)
    k = kernels[:, None]             # (Gt, 1, kz, kx, ky)
    return lax.conv_general_dilated(
        x, k, window_strides=(1, 1, 1), padding="SAME",
        dimension_numbers=("NCDHW", "OIDHW", "NCDHW"))


def gather_vox_at_pts_cf(vox, pt_loc):
    # TODO(synk): Vox.vox_to_pts source is not provided; implemented as the natural
    # nearest-voxel gather of channel values at each (normalised) point location,
    # returned channel-first.  vox: (B, C, Z, X, Y); pt_loc: (B, P, 3) -> (B, C, P).
    B, C, Z, X, Y = vox.shape
    iz = jnp.clip((pt_loc[..., 0] * Z).astype(jnp.int32), 0, Z - 1)
    ix = jnp.clip((pt_loc[..., 1] * X).astype(jnp.int32), 0, X - 1)
    iy = jnp.clip((pt_loc[..., 2] * Y).astype(jnp.int32), 0, Y - 1)
    b_idx = jnp.arange(B)[:, None, None]
    c_idx = jnp.arange(C)[None, :, None]
    return vox[b_idx, c_idx, iz[:, None, :], ix[:, None, :], iy[:, None, :]]


# ----------------------------------------------------------------------------
# Parameter folding: observer cvx combination, BatchNorm, channel padding.
# ----------------------------------------------------------------------------
def fold_head_params(raw_layers, w_out_raw, b_out_raw, cvx, Gt, Ot, bn_eps=1e-5):
    """raw_layers[i] = (w (Cout, Cin), b (Cout,), gamma (Cout,), beta (Cout,)).
    Layer 0's Cin is the full feat_dim = 3 + 2*(Gt + Ot) with channel order
    [pt_loc | conv | obs | global(conv) | global(obs)] as in the PyTorch model.
    Folds the observer combination and eval-mode BatchNorm (running_mean=0,
    running_var=1) into the weights; keeps the global-max weight slices separate
    (the batch-dependent bias path is computed in the forward glue); pads all
    channel dims to multiples of 8 with zeros (exactly neutral).
    """
    w0, b0, g0, be0 = raw_layers[0]
    H0 = w0.shape[0]
    scale0 = g0 / jnp.sqrt(1.0 + bn_eps)
    s0, s1, s2, s3 = 3, 3 + Gt, 3 + Gt + Ot, 3 + 2 * Gt + Ot
    w0_loc, w0_conv, w0_obs = w0[:, :s0], w0[:, s0:s1], w0[:, s1:s2]
    w0_gconv, w0_gobs = w0[:, s2:s3], w0[:, s3:]

    # observer fold: obs_pts = cvx @ conv_pts  (channel-wise linear)  => fold into W0.
    w0_merged = jnp.concatenate([w0_loc, w0_conv + w0_obs @ cvx], axis=1)   # (H0, 3+Gt)

    F = 3 + Gt
    F_pad = _round_up(F, 8)
    H0_pad = _round_up(H0, 8)
    w0_fold = _pad_to(scale0[:, None] * w0_merged, (H0_pad, F_pad))

    bias_path = dict(
        w_gconv=_pad_to(w0_gconv, (H0_pad, Gt)),
        w_gobs=_pad_to(w0_gobs, (H0_pad, Ot)),
        b0=_pad_to(b0, (H0_pad,)),
        scale0=_pad_to(scale0, (H0_pad,)),
        beta0=_pad_to(be0, (H0_pad,)),
    )

    hidden = []
    cin_pad = H0_pad
    for (w, b, g, be) in raw_layers[1:]:
        cout = w.shape[0]
        scale = g / jnp.sqrt(1.0 + bn_eps)
        cout_pad = _round_up(cout, 8)
        w_fold = _pad_to(scale[:, None] * w, (cout_pad, cin_pad))
        b_fold = _pad_to((scale * b + be)[:, None], (cout_pad, 1))
        hidden.append((w_fold, b_fold))
        cin_pad = cout_pad

    C = w_out_raw.shape[0]
    C_pad = _round_up(C, 8)
    w_out = _pad_to(w_out_raw, (C_pad, cin_pad))
    b_out = _pad_to(b_out_raw[:, None], (C_pad, 1))

    return dict(F=F, F_pad=F_pad, H0_pad=H0_pad, w0=w0_fold, bias_path=bias_path,
                hidden=hidden, w_out=w_out, b_out=b_out)


# ----------------------------------------------------------------------------
# End-to-end forward.
# ----------------------------------------------------------------------------
def scene_net_multiclass_forward(vox, pt_loc, params, point_tile=2048):
    head = params["head"]
    conv_vox = geneo_conv3d(vox, params["geneo_kernels"])            # (B, Gt, Z, X, Y)
    conv_cf = gather_vox_at_pts_cf(conv_vox, pt_loc)                 # (B, Gt, P)
    B, Gt, P = conv_cf.shape

    # Per-point features, channel-first: [pt_loc(3) | conv_pts(Gt)] padded to F_pad.
    # TODO(synk): pt_loc doubles as normalized gather coordinates and raw MLP feature,
    # mirroring the reference usage (Vox.vox_to_pts source not available).
    loc_cf = jnp.transpose(pt_loc, (0, 2, 1))                        # (B, 3, P)
    feat = jnp.concatenate([loc_cf, conv_cf], axis=1)                # (B, 3+Gt, P)
    if head["F_pad"] != head["F"]:
        feat = jnp.pad(feat, ((0, 0), (0, head["F_pad"] - head["F"]), (0, 0)))

    # Global max-pool path (per batch), folded into the effective first-layer bias.
    gmax_conv = jnp.max(conv_cf, axis=2)                             # (B, Gt)
    obs_cf = jnp.einsum("og,bgp->bop", params["cvx"], conv_cf)       # (B, Ot, P)
    gmax_obs = jnp.max(obs_cf, axis=2)                               # (B, Ot)
    bp = head["bias_path"]
    b0_eff = (bp["scale0"][None, :]
              * (gmax_conv @ bp["w_gconv"].T
                 + gmax_obs @ bp["w_gobs"].T
                 + bp["b0"][None, :])
              + bp["beta0"][None, :])                                # (B, H0_pad)
    b0_eff = b0_eff[:, :, None]                                      # (B, H0_pad, 1)

    return scene_net_head(feat, b0_eff, head["w0"], head["hidden"],
                          head["w_out"], head["b_out"],
                          params["num_classes"], P, point_tile=point_tile)


if __name__ == "__main__":
    key = jax.random.PRNGKey(0)
    B, Z, X, Y = 2, 8, 8, 8
    P = 512
    geneo_num = {"cy": 2, "cone": 2, "neg": 1}      # 5 GENEO kernels per layer
    num_observers = [4]                              # single GENEO layer, 4 observers
    kernel_size = (3, 3, 3)
    hidden_dims = [32, 16]
    num_classes = 6
    bn_eps = 1e-5

    G = sum(geneo_num.values())
    Gt = G * len(num_observers)
    Ot = sum(num_observers)
    feat_dim = 3 + (Ot + Gt) * 2                     # = 21 here

    keys = jax.random.split(key, 5 + len(hidden_dims))
    vox = jax.random.uniform(keys[0], (B, Z, X, Y), jnp.float32)
    pt_loc = jax.random.uniform(keys[1], (B, P, 3), jnp.float32)

    # TODO(synk): real GENEO kernels are analytical cylinder/cone/neg-sphere operators
    # with learnable parameters; synthesised here as deterministic random 3-D kernels.
    geneo_kernels = 0.1 * jax.random.normal(keys[2], (Gt,) + kernel_size, jnp.float32)

    # Observer convex-combination coefficients (softmax -> convex), block-diagonal
    # across GENEO layers.
    cvx = jnp.zeros((Ot, Gt), jnp.float32)
    ckeys = jax.random.split(keys[3], len(num_observers))
    ro = rg = 0
    for li, no in enumerate(num_observers):
        blk = jax.nn.softmax(jax.random.normal(ckeys[li], (no, G), jnp.float32), axis=1)
        cvx = cvx.at[ro:ro + no, rg:rg + G].set(blk)
        ro += no
        rg += G

    # Raw MLP head parameters (Conv1d k=1 weights/biases, fresh BatchNorm1d).
    dims = [feat_dim] + hidden_dims
    raw_layers = []
    for i in range(len(hidden_dims)):
        cin, cout = dims[i], dims[i + 1]
        wk, bk = jax.random.split(keys[4 + i])
        w = jax.random.normal(wk, (cout, cin), jnp.float32) / jnp.sqrt(cin)
        b = 0.01 * jax.random.normal(bk, (cout,), jnp.float32)
        raw_layers.append((w, b,
                           jnp.ones((cout,), jnp.float32),    # BN gamma
                           jnp.zeros((cout,), jnp.float32)))  # BN beta
    wk, bk = jax.random.split(keys[4 + len(hidden_dims)])
    w_out_raw = (jax.random.normal(wk, (num_classes, hidden_dims[-1]), jnp.float32)
                 / jnp.sqrt(hidden_dims[-1]))
    b_out_raw = 0.01 * jax.random.normal(bk, (num_classes,), jnp.float32)

    head = fold_head_params(raw_layers, w_out_raw, b_out_raw, cvx, Gt, Ot, bn_eps)
    params = dict(geneo_kernels=geneo_kernels, cvx=cvx, head=head,
                  num_classes=num_classes)

    out = scene_net_multiclass_forward(vox, pt_loc, params)
    out = jax.block_until_ready(out)
    assert out.shape == (B, num_classes, P) and out.dtype == jnp.float32
    print("KERNEL_OK")
</pallas_src>

<mosaic_0001>
module attributes {stable_mosaic.version = 11 : i64} {
  func.func @_scene_net_head_kernel(%arg0: i32, %arg1: i32, %arg2: memref<1x8x512xf32, #tpu.memory_space<vmem>>, %arg3: memref<1x32x1xf32, #tpu.memory_space<vmem>>, %arg4: memref<32x8xf32, #tpu.memory_space<vmem>>, %arg5: memref<16x32xf32, #tpu.memory_space<vmem>>, %arg6: memref<16x1xf32, #tpu.memory_space<vmem>>, %arg7: memref<8x16xf32, #tpu.memory_space<vmem>>, %arg8: memref<8x1xf32, #tpu.memory_space<vmem>>, %arg9: memref<1x8x512xf32, #tpu.memory_space<vmem>>) attributes {dimension_semantics = [#tpu.dimension_semantics<parallel>, #tpu.dimension_semantics<parallel>], iteration_bounds = array<i64: 2, 1>, scalar_prefetch = 0 : i64, scratch_operands = 0 : i64, tpu.core_type = #tpu.core_type<tc>, window_params = [{transform_indices = @transform_0, window_bounds = array<i64: 1, 8, 512>}, {transform_indices = @transform_1, window_bounds = array<i64: 1, 32, 1>}, {pipeline_mode = #tpu.pipeline_mode<synchronous>, transform_indices = @transform_2, window_bounds = array<i64: 32, 8>}, {pipeline_mode = #tpu.pipeline_mode<synchronous>, transform_indices = @transform_3, window_bounds = array<i64: 16, 32>}, {pipeline_mode = #tpu.pipeline_mode<synchronous>, transform_indices = @transform_4, window_bounds = array<i64: 16, 1>}, {pipeline_mode = #tpu.pipeline_mode<synchronous>, transform_indices = @transform_5, window_bounds = array<i64: 8, 16>}, {pipeline_mode = #tpu.pipeline_mode<synchronous>, transform_indices = @transform_6, window_bounds = array<i64: 8, 1>}, {transform_indices = @transform_7, window_bounds = array<i64: 1, 8, 512>}]} {
    %c0 = arith.constant 0 : index
    %c0_0 = arith.constant 0 : index
    %c0_1 = arith.constant 0 : index
    %0 = vector.load %arg2[%c0, %c0_0, %c0_1] : memref<1x8x512xf32, #tpu.memory_space<vmem>>, vector<1x8x512xf32>
    %1 = vector.shape_cast %0 : vector<1x8x512xf32> to vector<8x512xf32>
    %c0_2 = arith.constant 0 : index
    %c0_3 = arith.constant 0 : index
    %2 = vector.load %arg4[%c0_2, %c0_3] : memref<32x8xf32, #tpu.memory_space<vmem>>, vector<32x8xf32>
    %cst = arith.constant dense<0.000000e+00> : vector<32x512xf32>
    %3 = tpu.matmul %2, %1, %cst {dimension_numbers = #tpu.dot_dimension_numbers<[1], [0], [0], [1], [0, 0, 1, 1], [], []>} : vector<32x8xf32>, vector<8x512xf32>, vector<32x512xf32> -> vector<32x512xf32>
    %c0_4 = arith.constant 0 : index
    %c0_5 = arith.constant 0 : index
    %c0_6 = arith.constant 0 : index
    %4 = vector.load %arg3[%c0_4, %c0_5, %c0_6] : memref<1x32x1xf32, #tpu.memory_space<vmem>>, vector<1x32x1xf32>
    %5 = vector.shape_cast %4 : vector<1x32x1xf32> to vector<32x1xf32>
    %6 = vector.broadcast %5 : vector<32x1xf32> to vector<32x512xf32>
    %7 = arith.addf %3, %6 : vector<32x512xf32>
    %cst_7 = arith.constant 0.000000e+00 : f32
    %8 = vector.broadcast %cst_7 : f32 to vector<32x512xf32>
    %9 = arith.maximumf %7, %8 : vector<32x512xf32>
    %c0_8 = arith.constant 0 : index
    %c0_9 = arith.constant 0 : index
    %10 = vector.load %arg5[%c0_8, %c0_9] : memref<16x32xf32, #tpu.memory_space<vmem>>, vector<16x32xf32>
    %cst_10 = arith.constant dense<0.000000e+00> : vector<16x512xf32>
    %11 = tpu.matmul %10, %9, %cst_10 {dimension_numbers = #tpu.dot_dimension_numbers<[1], [0], [0], [1], [0, 0, 1, 1], [], []>} : vector<16x32xf32>, vector<32x512xf32>, vector<16x512xf32> -> vector<16x512xf32>
    %c0_11 = arith.constant 0 : index
    %c0_12 = arith.constant 0 : index
    %12 = vector.load %arg6[%c0_11, %c0_12] : memref<16x1xf32, #tpu.memory_space<vmem>>, vector<16x1xf32>
    %13 = vector.broadcast %12 : vector<16x1xf32> to vector<16x512xf32>
    %14 = arith.addf %11, %13 : vector<16x512xf32>
    %cst_13 = arith.constant 0.000000e+00 : f32
    %15 = vector.broadcast %cst_13 : f32 to vector<16x512xf32>
    %16 = arith.maximumf %14, %15 : vector<16x512xf32>
    %c0_14 = arith.constant 0 : index
    %c0_15 = arith.constant 0 : index
    %17 = vector.load %arg7[%c0_14, %c0_15] : memref<8x16xf32, #tpu.memory_space<vmem>>, vector<8x16xf32>
    %cst_16 = arith.constant dense<0.000000e+00> : vector<8x512xf32>
    %18 = tpu.matmul %17, %16, %cst_16 {dimension_numbers = #tpu.dot_dimension_numbers<[1], [0], [0], [1], [0, 0, 1, 1], [], []>} : vector<8x16xf32>, vector<16x512xf32>, vector<8x512xf32> -> vector<8x512xf32>
    %c0_17 = arith.constant 0 : index
    %c0_18 = arith.constant 0 : index
    %19 = vector.load %arg8[%c0_17, %c0_18] : memref<8x1xf32, #tpu.memory_space<vmem>>, vector<8x1xf32>
    %20 = vector.broadcast %19 : vector<8x1xf32> to vector<8x512xf32>
    %21 = arith.addf %18, %20 : vector<8x512xf32>
    %c0_19 = arith.constant 0 : index
    %c0_20 = arith.constant 0 : index
    %c0_21 = arith.constant 0 : index
    %22 = vector.load %arg9[%c0_19, %c0_20, %c0_21] : memref<1x8x512xf32, #tpu.memory_space<vmem>>, vector<1x8x512xf32>
    %23 = vector.shape_cast %22 : vector<1x8x512xf32> to vector<8x512xf32>
    %24 = vector.shape_cast %21 : vector<8x512xf32> to vector<1x8x512xf32>
    tpu.vector_store %arg9[%c0_19, %c0_20, %c0_21], %24 {strides = array<i32>} : memref<1x8x512xf32, #tpu.memory_space<vmem>>, vector<1x8x512xf32>,
    return
  }
  func.func @transform_0(%arg0: i32, %arg1: i32) -> (i32, i32, i32) {
    %c0_i32 = arith.constant 0 : i32
    %c0_i32_0 = arith.constant 0 : i32
    return %arg0, %c0_i32, %arg1 : i32, i32, i32
  }
  func.func @transform_1(%arg0: i32, %arg1: i32) -> (i32, i32, i32) {
    %c0_i32 = arith.constant 0 : i32
    %c0_i32_0 = arith.constant 0 : i32
    %c0_i32_1 = arith.constant 0 : i32
    return %arg0, %c0_i32, %c0_i32_0 : i32, i32, i32
  }
  func.func @transform_2(%arg0: i32, %arg1: i32) -> (i32, i32) {
    %c0_i32 = arith.constant 0 : i32
    %c0_i32_0 = arith.constant 0 : i32
    %c0_i32_1 = arith.constant 0 : i32
    return %c0_i32, %c0_i32_0 : i32, i32
  }
  func.func @transform_3(%arg0: i32, %arg1: i32) -> (i32, i32) {
    %c0_i32 = arith.constant 0 : i32
    %c0_i32_0 = arith.constant 0 : i32
    %c0_i32_1 = arith.constant 0 : i32
    return %c0_i32, %c0_i32_0 : i32, i32
  }
  func.func @transform_4(%arg0: i32, %arg1: i32) -> (i32, i32) {
    %c0_i32 = arith.constant 0 : i32
    %c0_i32_0 = arith.constant 0 : i32
    %c0_i32_1 = arith.constant 0 : i32
    return %c0_i32, %c0_i32_0 : i32, i32
  }
  func.func @transform_5(%arg0: i32, %arg1: i32) -> (i32, i32) {
    %c0_i32 = arith.constant 0 : i32
    %c0_i32_0 = arith.constant 0 : i32
    %c0_i32_1 = arith.constant 0 : i32
    return %c0_i32, %c0_i32_0 : i32, i32
  }
  func.func @transform_6(%arg0: i32, %arg1: i32) -> (i32, i32) {
    %c0_i32 = arith.constant 0 : i32
    %c0_i32_0 = arith.constant 0 : i32
    %c0_i32_1 = arith.constant 0 : i32
    return %c0_i32, %c0_i32_0 : i32, i32
  }
  func.func @transform_7(%arg0: i32, %arg1: i32) -> (i32, i32, i32) {
    %c0_i32 = arith.constant 0 : i32
    %c0_i32_0 = arith.constant 0 : i32
    return %arg0, %c0_i32, %arg1 : i32, i32, i32
  }
}

</mosaic_0001>

<bundles_post_ra>
// kernel: tpu_custom_call.1
= control target key start
LH: loop header
LB: loop body
LE: loop exit
PB: predicated region body
PF: predicated region fallthrough
CT: control target
= control target key end

     0   :  { %12 = vsyncpa [#allocation3], 0  ;;  %s1212_s0 = inlined_call_operand.vmem [shape: f32[2,8,512], index: 0, kind: input, shape index: {}]   ;;  %s1213_s1 = inlined_call_operand.vmem [shape: f32[2,32,1], index: 1, kind: input, shape index: {}]   ;;  %s1214_s2 = inlined_call_operand.vmem [shape: f32[32,8], index: 2, kind: input, shape index: {}]   ;;  %s1215_s3 = inlined_call_operand.vmem [shape: f32[16,32], index: 3, kind: input, shape index: {}]   ;;  %s1216_s4 = inlined_call_operand.vmem [shape: f32[16,1], index: 4, kind: input, shape index: {}]   ;;  %s1217_s5 = inlined_call_operand.vmem [shape: f32[8,16], index: 5, kind: input, shape index: {}]   ;;  %s1218_s6 = inlined_call_operand.vmem [shape: f32[8,1], index: 6, kind: input, shape index: {}]   ;;  %s1219_s7 = inlined_call_operand.hbm [shape: f32[2,8,512], index: 7, kind: output, shape index: {}]  }
   0x1   :  { %14 = vsyncpa [#allocation3 + $0x1], 0  ;;  %s1054_s24 = smov 0   ;;  %s1056_s25 = smov 0  }
   0x2   :  { %s1058_s26 = smov 0   ;;  %s1060_s27 = smov 0  }
   0x3   :  { %s1062_s28 = smov 0   ;;  %s1064_s29 = smov 0  }
   0x4 LB: > { %s828_s30 = sadd.s32 4294967295, %s1011_s29   ;;  %s829_s8 = sadd.s32 4294967294, %s1011_s29   ;;  %s1011_s29 = sphi %s1064_s29, %s20_s29   ;;  %s1007_s28 = sphi %s1062_s28, %s1226_s28   ;;  %s1003_s27 = sphi %s1060_s27, %s1225_s27   ;;  %s999_s26 = sphi %s1058_s26, %s1224_s26   ;;  %s995_s25 = sphi %s1056_s25, %s1223_s25   ;;  %s991_s24 = sphi %s1054_s24, %s1222_s24  }
   0x5   : > { %s32_s9 = sadd.s32 1, %s1007_s28  ;;  %s200_s10 = sadd.s32 1, %s999_s26 }
   0x6   : > { %p34_p0 = scmp.ge.s32.totalorder %s32_s9, 2  ;;  %p210_p1 = scmp.ne.s32.totalorder %s999_s26, %s995_s25 }
   0x7   : > { %p211_p2 = scmp.eq.s32.totalorder %s828_s30, 1  ;;  %p216_p3 = scmp.ne.s32.totalorder %s995_s25, %s991_s24 }
   0x8   : > { %s1228_s9 = smov (%p34_p0, %s32_s9), 0  ;;  %p217_p5 = scmp.eq.s32.totalorder %s829_s8, 1 }
   0x9   : > { %p1094_p4 = por %p211_p2, %p210_p1  ;;  %s195_s12 = ssub.s32 %s1007_s28, %s1228_s9 }
   0xa   : > { %p832_p6 = scmp.ge.s32.totalorder %s1011_s29, 1  ;;  %p198_p7 = scmp.eq.s32.totalorder %s195_s12, 0 }
   0xb   : > { %p1101_p8 = por %p217_p5, %p216_p3  ;;  %p271_p9 = scmp.lt.s32.totalorder %s1011_s29, 3 }
   0xc   : > { %s1107_s14 = scalar_select %p198_p7, %s999_s26, %s200_s10  }
   0xd   : > { %p272_p10 = pnand %p832_p6, %p271_p9 }
   0xe   : > { %p313_p11 = scmp.lt.s32.totalorder (!%p272_p10), %s1003_s27, 1  ;;  %s309_s17 = sand.u32 (!%p272_p10), 1, %s995_s25  }
   0xf   : > { %275 = sbr.rel (%p272_p10) target bundleno = 480 (0x1e0), region = 48  ;;  %s833_s18 = sshll.u32 (!%p272_p10), %s309_s17, 5 }
  0x10   : > { %s873_s20 = sshll.u32 (!%p272_p10), %s1003_s27, 5  ;;  %s722_s10 = scalar_lea.sflag (!%p272_p10), [#allocation3], %s309_s17 }
  0x11   : > { %s735_s23 = scalar_lea.hbm (!%p272_p10), %s1219_s7, %s873_s20 }
  0x12   : > { %s739_s8 = sshll.u32 (!%p272_p10), %s735_s23, 4  ;;  %s740_s8 = int_to_ptr.hbm [resolvable:$true] %s739_s8 }
  0x13   : > { %s947_s12 = sshra.s32 (!%p272_p10), %s740_s8, 4  ;;  %s948_s12 = int_to_ptr.hbm [resolvable:$true] %s947_s12 }
  0x14   : > { %v1013_v0 = vmov 0   ;;  %s314_s15 = scalar_select %p313_p11, %s1003_s27, 1  ;;  %v332_v1 = vld [vmem:[%s1214_s2] sm:$0xff]  ;;  %vm360_vm0 = vcmask 64512   ;;  %v333_v8 = vld [vmem:[%s1214_s2 + $0x8] sm:$0xff]  ;;  %v334_v11 = vld [vmem:[%s1214_s2 + $0x10] sm:$0xff] }
  0x15   : > { %931 = vset.pattern.permute.xlu1 %v1013_v0  ;;  %930 = vset.pattern.permute.xlu0 %v1013_v0  ;;  %v627_v12 = vld [vmem:[%s1218_s6] sm:$0xff]  ;;  %v335_v13 = vld [vmem:[%s1214_s2 + $0x18] sm:$0xff]  ;;  %v508_v26 = vld [vmem:[%s1216_s4 + $0x8] sm:$0xff]  ;;  %vm519_vm1 = vcmask 261120   ;;  %vm633_vm2 = vcmask 130048   ;;  %p954_p1 = scmp.lt.s32.totalorder %s948_s12, %s1219_s7 }
  0x16   : > { %932 = vset.pattern.permute.xlu2 %v1013_v0  ;;  %s871_s16 = sshll.u32 %s314_s15, 5  ;;  %v507_v36 = vld [vmem:[%s1216_s4] sm:$0xff]  ;;  %s949_s15 = scalar_lea.hbm %s948_s12, 32 }
  0x17   : > { %s320_s19 = scalar_lea.vmem %s1212_s0, %s871_s16  ;;  %s326_s30 = scalar_lea.vmem %s1213_s1, %s871_s16  ;;  %516 = vperm.xlu2 %932, %v508_v26   ;;  %v505_v60 = vld [vmem:[%s1215_s3] sm:$0xff] }
  0x18   : > { %v328_v2 = vld [vmem:[%s320_s19] sm:$0xff]  ;;  %v329_v3 = vld [vmem:[%s320_s19 + $0x8] sm:$0xff]  ;;  %v330_v4 = vld [vmem:[%s320_s19 + $0x10] sm:$0xff]  ;;  %p950_p12 = scmp.ne.s32.totalorder %s948_s12, %s949_s15 }
  0x19   : > { %388 = vmatpush.msra.mxu0 %v328_v2  ;;  %417 = vmatpush.msra.mxu1 %v329_v3  ;;  %v331_v5 = vld [vmem:[%s320_s19 + $0x18] sm:$0xff]  ;;  %v337_v6 = vld [vmem:[%s326_s30 + $0x8] sm:$0xff]  ;;  %v336_v9 = vld [vmem:[%s326_s30] sm:$0xff]  ;;  %s311_s19 = scalar_lea.vmem [#allocation2], %s833_s18  ;;  %s953_s18 = scalar_lea.hbm %s1219_s7, 64 }
  0x1a   : > { %446 = vmatpush.msra.mxu2 %v330_v4  ;;  %475 = vmatpush.msra.mxu3 %v331_v5  ;;  %v339_v7 = vld [vmem:[%s326_s30 + $0x18] sm:$0xff]  ;;  %v338_v10 = vld [vmem:[%s326_s30 + $0x10] sm:$0xff]  ;;  %v506_v5 = vld [vmem:[%s1215_s3 + $0x8] sm:$0xff]  ;;  %s737_s30 = sshll.u32 %s311_s19, 4  ;;  %p951_p13 = pnand %p950_p12, %p1094_p4  ;;  %s738_s30 = int_to_ptr.vmem [resolvable:$true] %s737_s30 }
  0x1b   : > { %838 = vmatmul.msk.f32.vlgmr.msra.gmra.mxu0 %vm360_vm0, %v332_v1  ;;  %842 = vmatmul.msk.f32.vlgmr.msra.gmra.mxu1 %vm360_vm0, %v332_v1  ;;  %p955_p2 = scmp.lt.s32.totalorder %s953_s18, %s949_s15 }
  0x1c   : > { %846 = vmatmul.msk.f32.vlgmr.msra.gmra.mxu2 %vm360_vm0, %v332_v1  ;;  %850 = vmatmul.msk.f32.vlgmr.msra.gmra.mxu3 %vm360_vm0, %v332_v1  ;;  %p952_p0 = pneg %p951_p13 }
  0x1d   : > { %347 = vperm.xlu1 %931, %v337_v6   ;;  %357 = vperm.xlu0 %930, %v339_v7   ;;  %p956_p3 = por %p955_p2, %p954_p1 }
  0x1f   : > { %511 = vperm.xlu2 %932, %v507_v36   ;;  %p957_p5 = pnand %p956_p3, %p952_p0 }
  0x23   : > { %839 = vmatmul.msk.f32.gmra.mxu0 %vm360_vm0, %v333_v8  ;;  %843 = vmatmul.msk.f32.gmra.mxu1 %vm360_vm0, %v333_v8 }
  0x24   : > { %847 = vmatmul.msk.f32.gmra.mxu2 %vm360_vm0, %v333_v8  ;;  %851 = vmatmul.msk.f32.gmra.mxu3 %vm360_vm0, %v333_v8 }
  0x25   : > { %342 = vperm.xlu1 %931, %v336_v9   ;;  %352 = vperm.xlu0 %930, %v338_v10  }
  0x2b   : > { %840 = vmatmul.msk.f32.gmra.mxu0 %vm360_vm0, %v334_v11  ;;  %844 = vmatmul.msk.f32.gmra.mxu1 %vm360_vm0, %v334_v11 }
  0x2c   : > { %848 = vmatmul.msk.f32.gmra.mxu2 %vm360_vm0, %v334_v11  ;;  %852 = vmatmul.msk.f32.gmra.mxu3 %vm360_vm0, %v334_v11 }
  0x2d   : > { %630 = vperm.xlu0 %930, %v627_v12  }
  0x33   : > { %841 = vmatmul.msk.f32.gmra.mxu0 %vm360_vm0, %v335_v13  ;;  %845 = vmatmul.msk.f32.gmra.mxu1 %vm360_vm0, %v335_v13 }
  0x34   : > { %849 = vmatmul.msk.f32.gmra.mxu2 %vm360_vm0, %v335_v13  ;;  %853 = vmatmul.msk.f32.gmra.mxu3 %vm360_vm0, %v335_v13 }
  0x71   : > { %v517_v6 = vpop.permute.xlu2 %516 }
  0x79   : > { %v512_v9 = vpop.permute.xlu2 %511 }
  0x8f   : > { %v358_v20 = vpop.permute.xlu0 %357  ;;  %v348_v25 = vpop.permute.xlu1 %347 }
  0x97   : > { %v353_v27 = vpop.permute.xlu0 %352  ;;  %v343_v41 = vpop.permute.xlu1 %342 }
  0x98   : > { %v390_v14 = vpop.f32.mrf.mxu0  ;;  %v419_v15 = vpop.f32.mrf.mxu1 }
  0x99   : > { %v391_v44 = vadd.f32 %v390_v14, %v343_v41  ;;  %v420_v45 = vadd.f32 %v419_v15, %v343_v41 }
  0x9b   : > { %v489_v54 = vmax.f32 %v391_v44, 0.0  ;;  %v490_v55 = vmax.f32 %v420_v45, 0.0 }
  0x9f   : > { %v448_v16 = vpop.f32.mrf.mxu2  ;;  %v477_v17 = vpop.f32.mrf.mxu3 }
  0xa0   : > { %v393_v18 = vpop.f32.mrf.mxu0  ;;  %v422_v19 = vpop.f32.mrf.mxu1  ;;  %v449_v61 = vadd.f32 %v448_v16, %v343_v41  ;;  %v478_v62 = vadd.f32 %v477_v17, %v343_v41 }
  0xa1   : > { %v394_v37 = vadd.f32 %v393_v18, %v348_v25  ;;  %v423_v38 = vadd.f32 %v422_v19, %v348_v25 }
  0xa2   : > { %v491_v3 = vmax.f32 %v449_v61, 0.0  ;;  %v492_v4 = vmax.f32 %v478_v62, 0.0 }
  0xa3   : > { %v493_v46 = vmax.f32 %v394_v37, 0.0  ;;  %v494_v47 = vmax.f32 %v423_v38, 0.0 }
  0xa7   : > { %v451_v21 = vpop.f32.mrf.mxu2  ;;  %v480_v22 = vpop.f32.mrf.mxu3 }
  0xa8   : > { %v396_v23 = vpop.f32.mrf.mxu0  ;;  %v425_v24 = vpop.f32.mrf.mxu1  ;;  %v452_v56 = vadd.f32 %v451_v21, %v348_v25  ;;  %v481_v57 = vadd.f32 %v480_v22, %v348_v25  ;;  %v626_v22 = vld [vmem:[%s1217_s5] sm:$0xff] }
  0xa9   : > { %v397_v34 = vadd.f32 %v396_v23, %v353_v27  ;;  %v426_v35 = vadd.f32 %v425_v24, %v353_v27 }
  0xaa   : > { %v495_v1 = vmax.f32 %v452_v56, 0.0  ;;  %v496_v2 = vmax.f32 %v481_v57, 0.0 }
  0xab   : > { %v497_v42 = vmax.f32 %v397_v34, 0.0  ;;  %v498_v43 = vmax.f32 %v426_v35, 0.0 }
  0xaf   : > { %v454_v28 = vpop.f32.mrf.mxu2  ;;  %v483_v29 = vpop.f32.mrf.mxu3 }
  0xb0   : > { %v399_v30 = vpop.f32.mrf.mxu0  ;;  %v428_v31 = vpop.f32.mrf.mxu1  ;;  %v455_v50 = vadd.f32 %v454_v28, %v353_v27  ;;  %v484_v51 = vadd.f32 %v483_v29, %v353_v27 }
  0xb1   : > { %v400_v32 = vadd.f32 %v399_v30, %v358_v20  ;;  %v429_v33 = vadd.f32 %v428_v31, %v358_v20 }
  0xb2   : > { %v499_v63 = vmax.f32 %v455_v50, 0.0  ;;  %v500_v0 = vmax.f32 %v484_v51, 0.0 }
  0xb3   : > { %v501_v39 = vmax.f32 %v400_v32, 0.0  ;;  %v502_v40 = vmax.f32 %v429_v33, 0.0  ;;  %v631_v33 = vpop.permute.xlu0 %630 }
  0xb5   : > { %538 = vmatpush.msrb.mxu0 %v501_v39  ;;  %561 = vmatpush.msrb.mxu1 %v502_v40 }
  0xb7   : > { %v457_v48 = vpop.f32.mrf.mxu2  ;;  %v486_v49 = vpop.f32.mrf.mxu3  ;;  %539 = vmatpush.msrb.mxu0 %v497_v42  ;;  %562 = vmatpush.msrb.mxu1 %v498_v43 }
  0xb8   : > { %v458_v52 = vadd.f32 %v457_v48, %v358_v20  ;;  %v487_v53 = vadd.f32 %v486_v49, %v358_v20 }
  0xb9   : > { %540 = vmatpush.msrb.mxu0 %v493_v46  ;;  %563 = vmatpush.msrb.mxu1 %v494_v47 }
  0xba   : > { %v503_v58 = vmax.f32 %v458_v52, 0.0  ;;  %v504_v59 = vmax.f32 %v487_v53, 0.0 }
  0xbb   : > { %541 = vmatpush.msrb.mxu0 %v489_v54  ;;  %564 = vmatpush.msrb.mxu1 %v490_v55 }
  0xbc   : > { %584 = vmatpush.msrb.mxu2 %v503_v58  ;;  %607 = vmatpush.msrb.mxu3 %v504_v59 }
  0xbd   : > { %854 = vmatmul.msk.f32.vlgmr.msrb.gmra.mxu0 %vm519_vm1, %v505_v60  ;;  %856 = vmatmul.msk.f32.vlgmr.msrb.gmra.mxu1 %vm519_vm1, %v505_v60 }
  0xbe   : > { %585 = vmatpush.msrb.mxu2 %v499_v63  ;;  %608 = vmatpush.msrb.mxu3 %v500_v0 }
  0xc0   : > { %586 = vmatpush.msrb.mxu2 %v495_v1  ;;  %609 = vmatpush.msrb.mxu3 %v496_v2 }
  0xc2   : > { %587 = vmatpush.msrb.mxu2 %v491_v3  ;;  %610 = vmatpush.msrb.mxu3 %v492_v4 }
  0xc3   : > { %858 = vmatmul.msk.f32.vlgmr.msrb.gmra.mxu2 %vm519_vm1, %v505_v60  ;;  %860 = vmatmul.msk.f32.vlgmr.msrb.gmra.mxu3 %vm519_vm1, %v505_v60 }
  0xc5   : > { %855 = vmatmul.msk.f32.gmra.mxu0 %vm519_vm1, %v506_v5  ;;  %857 = vmatmul.msk.f32.gmra.mxu1 %vm519_vm1, %v506_v5 }
  0xcb   : > { %859 = vmatmul.msk.f32.gmra.mxu2 %vm519_vm1, %v506_v5  ;;  %861 = vmatmul.msk.f32.gmra.mxu3 %vm519_vm1, %v506_v5 }
 0x13a   : > { %v543_v7 = vpop.f32.mrf.mxu0  ;;  %v566_v8 = vpop.f32.mrf.mxu1 }
 0x13b   : > { %v544_v10 = vadd.f32 %v543_v7, %v512_v9  ;;  %v567_v11 = vadd.f32 %v566_v8, %v512_v9 }
 0x13d   : > { %v618_v18 = vmax.f32 %v544_v10, 0.0  ;;  %v619_v19 = vmax.f32 %v567_v11, 0.0 }
 0x142   : > { %v546_v12 = vpop.f32.mrf.mxu0  ;;  %v569_v13 = vpop.f32.mrf.mxu1 }
 0x143   : > { %v547_v14 = vadd.f32 %v546_v12, %v517_v6  ;;  %v570_v15 = vadd.f32 %v569_v13, %v517_v6 }
 0x145   : > { %v622_v16 = vmax.f32 %v547_v14, 0.0  ;;  %v623_v17 = vmax.f32 %v570_v15, 0.0 }
 0x146   : > { %v589_v20 = vpop.f32.mrf.mxu2  ;;  %v612_v21 = vpop.f32.mrf.mxu3 }
 0x147   : > { %651 = vmatpush.msra.mxu0 %v622_v16  ;;  %671 = vmatpush.msra.mxu1 %v623_v17  ;;  %v590_v25 = vadd.f32 %v589_v20, %v512_v9  ;;  %v613_v26 = vadd.f32 %v612_v21, %v512_v9 }
 0x149   : > { %652 = vmatpush.msra.mxu0 %v618_v18  ;;  %672 = vmatpush.msra.mxu1 %v619_v19  ;;  %v620_v31 = vmax.f32 %v590_v25, 0.0  ;;  %v621_v32 = vmax.f32 %v613_v26, 0.0 }
 0x14a   : > { %862 = vmatmul.msk.f32.vlgmr.msra.gmra.mxu0 %vm633_vm2, %v626_v22  ;;  %863 = vmatmul.msk.f32.vlgmr.msra.gmra.mxu1 %vm633_vm2, %v626_v22 }
 0x14e   : > { %v592_v23 = vpop.f32.mrf.mxu2  ;;  %v615_v24 = vpop.f32.mrf.mxu3 }
 0x14f   : > { %v593_v27 = vadd.f32 %v592_v23, %v517_v6  ;;  %v616_v28 = vadd.f32 %v615_v24, %v517_v6 }
 0x151   : > { %v624_v29 = vmax.f32 %v593_v27, 0.0  ;;  %v625_v30 = vmax.f32 %v616_v28, 0.0 }
 0x153   : > { %691 = vmatpush.msra.mxu2 %v624_v29  ;;  %711 = vmatpush.msra.mxu3 %v625_v30 }
 0x155   : > { %692 = vmatpush.msra.mxu2 %v620_v31  ;;  %712 = vmatpush.msra.mxu3 %v621_v32 }
 0x156   : > { %864 = vmatmul.msk.f32.vlgmr.msra.gmra.mxu2 %vm633_vm2, %v626_v22  ;;  %865 = vmatmul.msk.f32.vlgmr.msra.gmra.mxu3 %vm633_vm2, %v626_v22 }
 0x1c7   : > { %v654_v34 = vpop.f32.mrf.mxu0  ;;  %v674_v35 = vpop.f32.mrf.mxu1 }
 0x1c8   : > { %v655_v36 = vadd.f32 %v654_v34, %v631_v33  ;;  %v675_v37 = vadd.f32 %v674_v35, %v631_v33 }
 0x1ca   : > { %717 = vst [vmem:[%s311_s19] sm:$0xff] %v655_v36 }
 0x1cb   : > { %718 = vst [vmem:[%s311_s19 + $0x8] sm:$0xff] %v675_v37 }
 0x1d9   : > { %v694_v38 = vpop.f32.mrf.mxu2  ;;  %v714_v39 = vpop.f32.mrf.mxu3 }
 0x1da   : > { %v695_v40 = vadd.f32 %v694_v38, %v631_v33  ;;  %v715_v41 = vadd.f32 %v714_v39, %v631_v33 }
 0x1dc   : > { %719 = vst [vmem:[%s311_s19 + $0x10] sm:$0xff] %v695_v40 }
 0x1dd   : > { %720 = vst [vmem:[%s311_s19 + $0x18] sm:$0xff] %v715_v41 }
 0x1de   : > { %960 = shalt.err (!%p957_p5)
}
 0x1df   : > { %874 = dma.vmem_to_hbm [thread:$0]  (%p1094_p4), %s738_s30, 512, %s740_s8, %s722_s10  }
 0x1e0 PF: > { %p880_p6 = scmp.ge.s32.totalorder %s1011_s29, 2  ;;  %s751_s17 = sand.u32 1, %s991_s24  }
 0x1e1   : > { %s752_s19 = scalar_lea.sflag [#allocation3], %s751_s17 }
 0x1e2   : > { %p877_p7 = pnand %p880_p6, %p1101_p8 }
 0x1e4   : > { %p878_p9 = pneg %p877_p7 }
 0x1e6   : > { %986 = dma.done.wait (%p878_p9), %s752_s19, 512  }
 0x1e7   : > { %988 = vsyncadd (%p878_p9), %s752_s19, 4294966784  ;;  %s20_s29 = sadd.s32 1, %s1011_s29   ;;  %s1222_s24 = smov %s995_s25 }
 0x1e8   : > { %p17_p10 = scmp.ge.s32.totalorder %s20_s29, 4   ;;  %s1223_s25 = smov %s999_s26 }
 0x1e9   : > { %s1224_s26 = smov %s1107_s14  ;;  %s1225_s27 = smov %s1007_s28 }
 0x1ea   : > { %s1226_s28 = smov %s1228_s9  ;;  %19 = sbr.rel (!%p17_p10) target bundleno = 4 (0x4), region = 86 }
 0x1ef   :  { %758 = vsyncpa [#allocation3], 1 }
 0x1f0   :  { %760 = vsyncpa [#allocation3 + $0x1], 1 }

</bundles_post_ra>
